<compile_context>
chip_gen: v7x
topology: tpu7x:2x2x1
jax: 0.10.0
libtpu: 0.0.40
codegen_flags: <defaults>
</compile_context>

<pallas_src>
import functools

import jax
import jax.numpy as jnp
from jax.experimental import pallas as pl
from jax.experimental.pallas import tpu as pltpu


def _round_up(x, m):
    return ((x + m - 1) // m) * m


def _pad_to(x, shape):
    pads = [(0, t - s) for s, t in zip(x.shape, shape)]
    return jnp.pad(x, pads)


def _wrapped_model_kernel(x_ref, w1_ref, b1_ref, w2_ref, b2_ref, out_ref,
                          acc_ref, *, s_true, n_pad_rows):
    # x_ref:  [TB, TS, HP] bf16      w1_ref: [HP, HP] bf16   b1_ref: [1, HP] f32
    # w2_ref: [HP, CP] bf16          b2_ref: [1, CP] f32
    # out_ref:[TB, CP] f32           acc_ref:[TB, HP] f32 (sequence-sum scratch)
    s_idx = pl.program_id(1)

    @pl.when(s_idx == 0)
    def _init():
        acc_ref[...] = jnp.zeros_like(acc_ref)

    tb, ts, hp = x_ref.shape

    # Single 2-D MXU matmul: [TB*TS, HP] x [HP, HP], bf16 in, f32 accumulate.
    x2d = x_ref[...].reshape(tb * ts, hp)
    h = jnp.dot(x2d, w1_ref[...], preferred_element_type=jnp.float32)
    h = h + b1_ref[...]                      # [1, HP] f32 bias, broadcasts over rows
    h = jax.nn.gelu(h, approximate=True)     # tanh GELU -> EUP (explicit choice)

    # Running f32 sequence sum, resident across the S grid axis.
    acc_ref[...] += h.reshape(tb, ts, hp).sum(axis=1)

    @pl.when(s_idx == pl.num_programs(1) - 1)
    def _finalize():
        acc = acc_ref[...]
        if n_pad_rows > 0:
            # Zero-padded sequence rows each contributed exactly gelu(b1);
            # remove them analytically (no per-tile masking needed).
            gelu_b1 = jax.nn.gelu(b1_ref[...], approximate=True)   # [1, HP] f32
            acc = acc - jnp.float32(n_pad_rows) * gelu_b1
        pooled = acc * (1.0 / float(s_true))                       # mean over true S
        logits = jnp.dot(pooled.astype(w2_ref.dtype), w2_ref[...],
                         preferred_element_type=jnp.float32)
        out_ref[...] = (logits + b2_ref[...]).astype(out_ref.dtype)


def wrapped_model_forward(input_embeds, w1, b1, w2, b2, *, ts_max=512):
    """Pallas equivalent of WrappedModel(model)(input_embeds) -> logits."""
    B, S, H = input_embeds.shape
    C = w2.shape[1]

    # Lane-dense padding: hidden and class dims to multiples of 128.
    HP = _round_up(H, 128)
    CP = _round_up(C, 128)

    # Tile sizes.  S is the pipelined (streaming) axis.  TS is either the full
    # (8-rounded) sequence, or ts_max (a multiple of 16, bf16-sublane friendly).
    TS = min(ts_max, _round_up(S, 8))
    SP = _round_up(S, TS)
    TB = min(_round_up(B, 8), 64)
    BP = _round_up(B, TB)

    # bf16 at the MXU inputs; biases stay f32 (elementwise math is f32).
    x_p = _pad_to(input_embeds.astype(jnp.bfloat16), (BP, SP, HP))
    w1_p = _pad_to(w1.astype(jnp.bfloat16), (HP, HP))
    b1_p = _pad_to(b1.astype(jnp.float32).reshape(1, -1), (1, HP))
    w2_p = _pad_to(w2.astype(jnp.bfloat16), (HP, CP))
    b2_p = _pad_to(b2.astype(jnp.float32).reshape(1, -1), (1, CP))

    grid = (BP // TB, SP // TS)

    kernel = functools.partial(_wrapped_model_kernel,
                               s_true=S, n_pad_rows=SP - S)

    out = pl.pallas_call(
        kernel,
        out_shape=jax.ShapeDtypeStruct((BP, CP), jnp.float32),
        grid_spec=pltpu.PrefetchScalarGridSpec(
            num_scalar_prefetch=0,
            grid=grid,
            in_specs=[
                pl.BlockSpec((TB, TS, HP), lambda b, s: (b, s, 0)),   # x tiles
                pl.BlockSpec((HP, HP), lambda b, s: (0, 0)),          # W1 (resident)
                pl.BlockSpec((1, HP), lambda b, s: (0, 0)),           # b1 (resident)
                pl.BlockSpec((HP, CP), lambda b, s: (0, 0)),          # W2 (resident)
                pl.BlockSpec((1, CP), lambda b, s: (0, 0)),           # b2 (resident)
            ],
            out_specs=pl.BlockSpec((TB, CP), lambda b, s: (b, 0)),    # same block over S
            scratch_shapes=[pltpu.VMEM((TB, HP), jnp.float32)],       # seq-sum accumulator
        ),
        compiler_params=pltpu.CompilerParams(
            dimension_semantics=("parallel", "arbitrary"),
            vmem_limit_bytes=32 * 1024 * 1024,
        ),
    )(x_p, w1_p, b1_p, w2_p, b2_p)

    # Slice away the batch / class padding.
    return out[:B, :C]


if __name__ == "__main__":
    B, S, H, C = 2, 8, 32, 4

    key = jax.random.PRNGKey(0)
    k_x, k_w1, k_b1, k_w2, k_b2 = jax.random.split(key, 5)

    input_embeds = jax.random.normal(k_x, (B, S, H), dtype=jnp.float32)
    w1 = jax.random.normal(k_w1, (H, H), dtype=jnp.float32) * 0.02
    b1 = jax.random.normal(k_b1, (1, H), dtype=jnp.float32) * 0.02
    w2 = jax.random.normal(k_w2, (H, C), dtype=jnp.float32) * 0.02
    b2 = jax.random.normal(k_b2, (1, C), dtype=jnp.float32) * 0.02

    logits = wrapped_model_forward(input_embeds, w1, b1, w2, b2)
    jax.block_until_ready(logits)

    # Pure-JAX f32 reference (same tanh-approx GELU).  Tolerance accounts for
    # the bf16 MXU inputs used inside the kernel (f32 accumulation throughout).
    h_ref = jax.nn.gelu(jnp.einsum("bsh,hd->bsd", input_embeds, w1) + b1[None],
                        approximate=True)
    ref = jnp.mean(h_ref, axis=1) @ w2 + b2

    assert logits.shape == (B, C)
    assert jnp.allclose(logits, ref, atol=5e-3, rtol=5e-2), (
        float(jnp.max(jnp.abs(logits - ref))))

    print("KERNEL_OK")
</pallas_src>

<mosaic_0001>
module attributes {stable_mosaic.version = 11 : i64} {
  func.func @_wrapped_model_kernel(%arg0: i32, %arg1: i32, %arg2: memref<8x8x128xbf16, #tpu.memory_space<vmem>>, %arg3: memref<128x128xbf16, #tpu.memory_space<vmem>>, %arg4: memref<1x128xf32, #tpu.memory_space<vmem>>, %arg5: memref<128x128xbf16, #tpu.memory_space<vmem>>, %arg6: memref<1x128xf32, #tpu.memory_space<vmem>>, %arg7: memref<8x128xf32, #tpu.memory_space<vmem>>, %arg8: memref<8x128xf32, #tpu.memory_space<vmem>>) attributes {dimension_semantics = [#tpu.dimension_semantics<parallel>, #tpu.dimension_semantics<arbitrary>], iteration_bounds = array<i64: 1, 1>, scalar_prefetch = 0 : i64, scratch_operands = 1 : i64, tpu.core_type = #tpu.core_type<tc>, window_params = [{transform_indices = @transform_0, window_bounds = array<i64: 8, 8, 128>}, {pipeline_mode = #tpu.pipeline_mode<synchronous>, transform_indices = @transform_1, window_bounds = array<i64: 128, 128>}, {pipeline_mode = #tpu.pipeline_mode<synchronous>, transform_indices = @transform_2, window_bounds = array<i64: 1, 128>}, {pipeline_mode = #tpu.pipeline_mode<synchronous>, transform_indices = @transform_3, window_bounds = array<i64: 128, 128>}, {pipeline_mode = #tpu.pipeline_mode<synchronous>, transform_indices = @transform_4, window_bounds = array<i64: 1, 128>}, {transform_indices = @transform_5, window_bounds = array<i64: 8, 128>}]} {
    %c0_i32 = arith.constant 0 : i32
    %0 = arith.cmpi eq, %arg1, %c0_i32 : i32
    %1 = arith.extui %0 : i1 to i32
    %c0_i32_0 = arith.constant 0 : i32
    %2 = arith.cmpi ne, %1, %c0_i32_0 : i32
    scf.if %2 {
      %cst_18 = arith.constant 0.000000e+00 : f32
      %31 = vector.broadcast %cst_18 : f32 to vector<8x128xf32>
      %c0_19 = arith.constant 0 : index
      %c0_20 = arith.constant 0 : index
      %32 = vector.load %arg8[%c0_19, %c0_20] : memref<8x128xf32, #tpu.memory_space<vmem>>, vector<8x128xf32>
      tpu.vector_store %arg8[%c0_19, %c0_20], %31 {strides = array<i32>} : memref<8x128xf32, #tpu.memory_space<vmem>>, vector<8x128xf32>,
    } else {
    }
    %c0 = arith.constant 0 : index
    %c0_1 = arith.constant 0 : index
    %c0_2 = arith.constant 0 : index
    %3 = vector.load %arg2[%c0, %c0_1, %c0_2] : memref<8x8x128xbf16, #tpu.memory_space<vmem>>, vector<8x8x128xbf16>
    %4 = vector.shape_cast %3 : vector<8x8x128xbf16> to vector<64x128xbf16>
    %c0_3 = arith.constant 0 : index
    %c0_4 = arith.constant 0 : index
    %5 = vector.load %arg3[%c0_3, %c0_4] : memref<128x128xbf16, #tpu.memory_space<vmem>>, vector<128x128xbf16>
    %cst = arith.constant dense<0.000000e+00> : vector<64x128xf32>
    %6 = tpu.matmul %4, %5, %cst {dimension_numbers = #tpu.dot_dimension_numbers<[1], [0], [0], [1], [0, 0, 1, 1], [], []>} : vector<64x128xbf16>, vector<128x128xbf16>, vector<64x128xf32> -> vector<64x128xf32>
    %c0_5 = arith.constant 0 : index
    %c0_6 = arith.constant 0 : index
    %7 = vector.load %arg4[%c0_5, %c0_6] : memref<1x128xf32, #tpu.memory_space<vmem>>, vector<1x128xf32>
    %8 = vector.broadcast %7 : vector<1x128xf32> to vector<64x128xf32>
    %9 = arith.addf %6, %8 : vector<64x128xf32>
    %10 = arith.mulf %9, %9 : vector<64x128xf32>
    %11 = arith.mulf %9, %10 : vector<64x128xf32>
    %cst_7 = arith.constant 4.471500e-02 : f32
    %12 = vector.broadcast %cst_7 : f32 to vector<64x128xf32>
    %13 = arith.mulf %12, %11 : vector<64x128xf32>
    %14 = arith.addf %9, %13 : vector<64x128xf32>
    %cst_8 = arith.constant 0.797884583 : f32
    %15 = vector.broadcast %cst_8 : f32 to vector<64x128xf32>
    %16 = arith.mulf %15, %14 : vector<64x128xf32>
    %17 = math.tanh %16 : vector<64x128xf32>
    %cst_9 = arith.constant 1.000000e+00 : f32
    %18 = vector.broadcast %cst_9 : f32 to vector<64x128xf32>
    %19 = arith.addf %18, %17 : vector<64x128xf32>
    %cst_10 = arith.constant 5.000000e-01 : f32
    %20 = vector.broadcast %cst_10 : f32 to vector<64x128xf32>
    %21 = arith.mulf %20, %19 : vector<64x128xf32>
    %22 = arith.mulf %9, %21 : vector<64x128xf32>
    %c0_11 = arith.constant 0 : index
    %c0_12 = arith.constant 0 : index
    %23 = vector.load %arg8[%c0_11, %c0_12] : memref<8x128xf32, #tpu.memory_space<vmem>>, vector<8x128xf32>
    %24 = vector.shape_cast %22 : vector<64x128xf32> to vector<8x8x128xf32>
    %cst_13 = arith.constant dense<0.000000e+00> : vector<8x128xf32>
    %25 = vector.multi_reduction <add>, %24, %cst_13 [1] : vector<8x8x128xf32> to vector<8x128xf32>
    %26 = arith.addf %23, %25 : vector<8x128xf32>
    %c0_14 = arith.constant 0 : index
    %c0_15 = arith.constant 0 : index
    %27 = vector.load %arg8[%c0_14, %c0_15] : memref<8x128xf32, #tpu.memory_space<vmem>>, vector<8x128xf32>
    tpu.vector_store %arg8[%c0_14, %c0_15], %26 {strides = array<i32>} : memref<8x128xf32, #tpu.memory_space<vmem>>, vector<8x128xf32>,
    %c0_i32_16 = arith.constant 0 : i32
    %28 = arith.cmpi eq, %arg1, %c0_i32_16 : i32
    %29 = arith.extui %28 : i1 to i32
    %c0_i32_17 = arith.constant 0 : i32
    %30 = arith.cmpi ne, %29, %c0_i32_17 : i32
    scf.if %30 {
      %c0_18 = arith.constant 0 : index
      %c0_19 = arith.constant 0 : index
      %31 = vector.load %arg8[%c0_18, %c0_19] : memref<8x128xf32, #tpu.memory_space<vmem>>, vector<8x128xf32>
      %cst_20 = arith.constant 1.250000e-01 : f32
      %32 = vector.broadcast %cst_20 : f32 to vector<8x128xf32>
      %33 = arith.mulf %31, %32 : vector<8x128xf32>
      %34 = arith.truncf %33 : vector<8x128xf32> to vector<8x128xbf16>
      %c0_21 = arith.constant 0 : index
      %c0_22 = arith.constant 0 : index
      %35 = vector.load %arg5[%c0_21, %c0_22] : memref<128x128xbf16, #tpu.memory_space<vmem>>, vector<128x128xbf16>
      %cst_23 = arith.constant dense<0.000000e+00> : vector<8x128xf32>
      %36 = tpu.matmul %34, %35, %cst_23 {dimension_numbers = #tpu.dot_dimension_numbers<[1], [0], [0], [1], [0, 0, 1, 1], [], []>} : vector<8x128xbf16>, vector<128x128xbf16>, vector<8x128xf32> -> vector<8x128xf32>
      %c0_24 = arith.constant 0 : index
      %c0_25 = arith.constant 0 : index
      %37 = vector.load %arg6[%c0_24, %c0_25] : memref<1x128xf32, #tpu.memory_space<vmem>>, vector<1x128xf32>
      %38 = vector.broadcast %37 : vector<1x128xf32> to vector<8x128xf32>
      %39 = arith.addf %36, %38 : vector<8x128xf32>
      %c0_26 = arith.constant 0 : index
      %c0_27 = arith.constant 0 : index
      %40 = vector.load %arg7[%c0_26, %c0_27] : memref<8x128xf32, #tpu.memory_space<vmem>>, vector<8x128xf32>
      tpu.vector_store %arg7[%c0_26, %c0_27], %39 {strides = array<i32>} : memref<8x128xf32, #tpu.memory_space<vmem>>, vector<8x128xf32>,
    } else {
    }
    return
  }
  func.func @transform_0(%arg0: i32, %arg1: i32) -> (i32, i32, i32) {
    %c0_i32 = arith.constant 0 : i32
    %c0_i32_0 = arith.constant 0 : i32
    return %arg0, %arg1, %c0_i32 : i32, i32, i32
  }
  func.func @transform_1(%arg0: i32, %arg1: i32) -> (i32, i32) {
    %c0_i32 = arith.constant 0 : i32
    %c0_i32_0 = arith.constant 0 : i32
    %c0_i32_1 = arith.constant 0 : i32
    return %c0_i32, %c0_i32_0 : i32, i32
  }
  func.func @transform_2(%arg0: i32, %arg1: i32) -> (i32, i32) {
    %c0_i32 = arith.constant 0 : i32
    %c0_i32_0 = arith.constant 0 : i32
    %c0_i32_1 = arith.constant 0 : i32
    return %c0_i32, %c0_i32_0 : i32, i32
  }
  func.func @transform_3(%arg0: i32, %arg1: i32) -> (i32, i32) {
    %c0_i32 = arith.constant 0 : i32
    %c0_i32_0 = arith.constant 0 : i32
    %c0_i32_1 = arith.constant 0 : i32
    return %c0_i32, %c0_i32_0 : i32, i32
  }
  func.func @transform_4(%arg0: i32, %arg1: i32) -> (i32, i32) {
    %c0_i32 = arith.constant 0 : i32
    %c0_i32_0 = arith.constant 0 : i32
    %c0_i32_1 = arith.constant 0 : i32
    return %c0_i32, %c0_i32_0 : i32, i32
  }
  func.func @transform_5(%arg0: i32, %arg1: i32) -> (i32, i32) {
    %c0_i32 = arith.constant 0 : i32
    %c0_i32_0 = arith.constant 0 : i32
    return %arg0, %c0_i32 : i32, i32
  }
}

</mosaic_0001>

<bundles_post_ra>
// kernel: tpu_custom_call.1
= control target key start
LH: loop header
LB: loop body
LE: loop exit
PB: predicated region body
PF: predicated region fallthrough
CT: control target
= control target key end

     0   :  { %10 = vsyncpa [#allocation4], 0  ;;  %s905_s0 = inlined_call_operand.hbm [shape: bf16[8,8,128], index: 0, kind: input, shape index: {}]   ;;  %s906_s1 = inlined_call_operand.hbm [shape: bf16[128,128], index: 1, kind: input, shape index: {}]   ;;  %s907_s2 = inlined_call_operand.vmem [shape: f32[1,128], index: 2, kind: input, shape index: {}]   ;;  %s908_s3 = inlined_call_operand.hbm [shape: bf16[128,128], index: 3, kind: input, shape index: {}]   ;;  %s909_s4 = inlined_call_operand.vmem [shape: f32[1,128], index: 4, kind: input, shape index: {}]   ;;  %s910_s5 = inlined_call_operand.hbm [shape: f32[8,128], index: 5, kind: output, shape index: {}]  }
   0x1   :  { %11 = vsyncpa [#allocation7], 0 }
   0x2   :  { %12 = vsyncpa [#allocation5], 0  ;;  %s741_s18 = smov [#allocation6]   ;;  %s742_s20 = smov [#allocation3]  }
   0x3   :  { %s30_s19 = sshll.u32 %s741_s18, 4  ;;  %s18_s21 = sshll.u32 %s742_s20, 4  ;;  %s31_s19 = int_to_ptr.vmem [resolvable:$true] %s30_s19  ;;  %s779_s21 = int_to_ptr.vmem [resolvable:$true] %s18_s21 }
   0x4   :  { %s647_s24 = scalar_lea.hbm %s906_s1, 1024 }
   0x5   :  { %p648_p0 = scmp.ne.s32.totalorder %s906_s1, %s647_s24  ;;  %p651_p1 = scmp.lt.u32.totalorder %s647_s24, %s906_s1 }
   0x7   :  { %p653_p2 = pnand %p651_p1, %p648_p0 }
   0x9   :  { %656 = shalt.err (!%p653_p2)
}
   0xa   :  { %s657_s29 = scalar_lea.vmem %s31_s19, 1024  ;;  %p662_p4 = scmp.lt.s32.totalorder %s31_s19, %s31_s19 }
   0xb   :  { %p658_p3 = scmp.ne.s32.totalorder %s31_s19, %s657_s29  ;;  %p663_p5 = scmp.lt.s32.totalorder %s657_s29, %s657_s29 }
   0xd   :  { %p664_p6 = por %p663_p5, %p662_p4 }
   0xf   :  { %p665_p7 = pnand %p664_p6, %p658_p3 }
  0x11   :  { %668 = shalt.err (!%p665_p7)
}
  0x12   :  { %s743_s30 = smov 64   ;;  %s744_s6 = smov 4  }
  0x13   :  { %36 = dma.hbm_to_vmem [thread:$0]  %s906_s1, 1024, %s31_s19, [#allocation7], %s743_s30, %s743_s30, %s744_s6  }
  0x14   :  { %s669_s11 = scalar_lea.hbm %s905_s0, 512 }
  0x15   :  { %p670_p8 = scmp.ne.s32.totalorder %s905_s0, %s669_s11  ;;  %p673_p9 = scmp.lt.u32.totalorder %s669_s11, %s905_s0 }
  0x17   :  { %p675_p10 = pnand %p673_p9, %p670_p8 }
  0x19   :  { %678 = shalt.err (!%p675_p10)
}
  0x1a   :  { %s679_s16 = scalar_lea.vmem %s779_s21, 512  ;;  %p684_p12 = scmp.lt.s32.totalorder %s779_s21, %s779_s21 }
  0x1b   :  { %p680_p11 = scmp.ne.s32.totalorder %s779_s21, %s679_s16  ;;  %p685_p13 = scmp.lt.s32.totalorder %s679_s16, %s679_s16 }
  0x1d   :  { %p686_p0 = por %p685_p13, %p684_p12 }
  0x1f   :  { %p687_p1 = pnand %p686_p0, %p680_p11 }
  0x21   :  { %690 = shalt.err (!%p687_p1)
}
  0x22   :  { %24 = dma.hbm_to_vmem [thread:$0]  %s905_s0, 512, %s779_s21, [#allocation4], %s743_s30, %s743_s30, %s744_s6  }
  0x23   :  { %s745_s18 = smov [#allocation8]   ;;  %s691_s23 = scalar_lea.hbm %s908_s3, 1024 }
  0x24   :  { %s44_s19 = sshll.u32 %s745_s18, 4  ;;  %p692_p2 = scmp.ne.s32.totalorder %s908_s3, %s691_s23  ;;  %s45_s19 = int_to_ptr.vmem [resolvable:$true] %s44_s19 }
  0x25   :  { %p695_p3 = scmp.lt.u32.totalorder %s691_s23, %s908_s3 }
  0x27   :  { %p697_p4 = pnand %p695_p3, %p692_p2 }
  0x29   :  { %700 = shalt.err (!%p697_p4)
}
  0x2a   :  { %s701_s28 = scalar_lea.vmem %s45_s19, 1024  ;;  %p706_p6 = scmp.lt.s32.totalorder %s45_s19, %s45_s19 }
  0x2b   :  { %p702_p5 = scmp.ne.s32.totalorder %s45_s19, %s701_s28  ;;  %p707_p7 = scmp.lt.s32.totalorder %s701_s28, %s701_s28 }
  0x2d   :  { %p708_p8 = por %p707_p7, %p706_p6 }
  0x2f   :  { %p709_p9 = pnand %p708_p8, %p702_p5 }
  0x31   :  { %712 = shalt.err (!%p709_p9)
}
  0x32   :  { %50 = dma.hbm_to_vmem [thread:$0]  %s908_s3, 1024, %s45_s19, [#allocation7], %s743_s30, %s743_s30, %s744_s6  }
  0x33   :  { %735 = dma.done.wait [#allocation4], 512  }
  0x34   :  { %736 = vsyncadd [#allocation4], 4294966784 }
  0x35   :  { %737 = dma.done.wait [#allocation7], 2048  }
  0x36   :  { %738 = vsyncadd [#allocation7], 4294965248  ;;  %v611_v0 = vld [vmem:[#allocation6] sm:$0xff]   ;;  %v612_v1 = vld [vmem:[#allocation6 + $0x8] sm:$0xff]   ;;  %v746_v13 = vmov 0.0   ;;  %vm747_vm0 = vmmov 0  }
  0x37   :  { %559 = vmatprep.subr.bf16.mxu0 %v611_v0  ;;  %v613_v2 = vld [vmem:[#allocation6 + $0x10] sm:$0xff]   ;;  %v614_v3 = vld [vmem:[#allocation6 + $0x18] sm:$0xff]   ;;  %v619_v4 = vld [vmem:[#allocation3] sm:$0xff]   ;;  %583 = vmatprep.subr.bf16.mxu1 %v746_v13  ;;  %vm365_vm1 = vcmask 1041409   ;;  %vm367_vm2 = vcmask 1042434   ;;  %vm369_vm3 = vcmask 1043459  }
  0x38   :  { %560 = vmatpush3.bf16.msra.mxu0 %v611_v0  ;;  %575 = vmatprep.mubr.bf16.mxu0 %v619_v4  ;;  %v615_v5 = vld [vmem:[#allocation6 + $0x20] sm:$0xff]   ;;  %v616_v6 = vld [vmem:[#allocation6 + $0x28] sm:$0xff]   ;;  %v617_v7 = vld [vmem:[#allocation6 + $0x30] sm:$0xff]   ;;  %vm371_vm4 = vcmask 1044484   ;;  %vm373_vm5 = vcmask 1045509   ;;  %vm375_vm6 = vcmask 1046534  }
  0x39   :  { %561 = vmatprep.subr.bf16.mxu0 %v612_v1  ;;  %v618_v8 = vld [vmem:[#allocation6 + $0x38] sm:$0xff]   ;;  %v620_v9 = vld [vmem:[#allocation3 + $0x8] sm:$0xff]   ;;  %v621_v10 = vld [vmem:[#allocation3 + $0x10] sm:$0xff]   ;;  %599 = vmatprep.mubr.msk.bf16.mxu1 %vm747_vm0, %v746_v13  ;;  %vm377_vm7 = vcmask 1047559   ;;  %s748_s6 = smov [#allocation9]  }
  0x3a   :  { %v622_v11 = vld [vmem:[#allocation3 + $0x18] sm:$0xff]   ;;  %v623_v12 = vld [vmem:[#allocation8] sm:$0xff]   ;;  %v624_v14 = vld [vmem:[#allocation8 + $0x8] sm:$0xff]   ;;  %s506_s7 = sshll.u32 %s748_s6, 4  ;;  %s507_s7 = int_to_ptr.vmem [resolvable:$true] %s506_s7 }
  0x3b   :  { %584 = vmatpush3.bf16.msra.mxu1 %v623_v12  ;;  %v625_v15 = vld [vmem:[#allocation8 + $0x10] sm:$0xff]   ;;  %v626_v16 = vld [vmem:[#allocation8 + $0x18] sm:$0xff]   ;;  %v627_v17 = vld [vmem:[#allocation8 + $0x20] sm:$0xff]   ;;  %s713_s8 = scalar_lea.vmem %s507_s7, 128  ;;  %p718_p11 = scmp.lt.s32.totalorder %s507_s7, %s507_s7 }
  0x3c   :  { %562 = vmatpush3.bf16.msra.mxu0 %v612_v1  ;;  %585 = vmatprep.subr.bf16.mxu1 %v746_v13  ;;  %v628_v18 = vld [vmem:[#allocation8 + $0x28] sm:$0xff]   ;;  %v629_v19 = vld [vmem:[#allocation8 + $0x30] sm:$0xff]   ;;  %v630_v20 = vld [vmem:[#allocation8 + $0x38] sm:$0xff]   ;;  %p714_p10 = scmp.ne.s32.totalorder %s507_s7, %s713_s8  ;;  %p719_p12 = scmp.lt.s32.totalorder %s713_s8, %s713_s8 }
  0x3d   :  { %563 = vmatprep.subr.bf16.mxu0 %v613_v2  ;;  %v516_v21 = vld [vmem:[%s907_s2] ss:$0 sm:$0xff] }
  0x3e   :  { %p720_p13 = por %p719_p12, %p718_p11 }
  0x3f   :  { %586 = vmatpush3.bf16.msra.mxu1 %v624_v14 }
  0x40   :  { %564 = vmatpush3.bf16.msra.mxu0 %v613_v2  ;;  %587 = vmatprep.subr.bf16.mxu1 %v746_v13  ;;  %p721_p0 = pnand %p720_p13, %p714_p10 }
  0x41   :  { %565 = vmatprep.subr.bf16.mxu0 %v614_v3 }
  0x43   :  { %588 = vmatpush3.bf16.msra.mxu1 %v625_v15 }
  0x44   :  { %566 = vmatpush3.bf16.msra.mxu0 %v614_v3  ;;  %589 = vmatprep.subr.bf16.mxu1 %v746_v13 }
  0x45   :  { %567 = vmatprep.subr.bf16.mxu0 %v615_v5 }
  0x47   :  { %590 = vmatpush3.bf16.msra.mxu1 %v626_v16 }
  0x48   :  { %568 = vmatpush3.bf16.msra.mxu0 %v615_v5  ;;  %591 = vmatprep.subr.bf16.mxu1 %v746_v13 }
  0x49   :  { %569 = vmatprep.subr.bf16.mxu0 %v616_v6 }
  0x4b   :  { %592 = vmatpush3.bf16.msra.mxu1 %v627_v17 }
  0x4c   :  { %570 = vmatpush3.bf16.msra.mxu0 %v616_v6  ;;  %593 = vmatprep.subr.bf16.mxu1 %v746_v13 }
  0x4d   :  { %571 = vmatprep.subr.bf16.mxu0 %v617_v7 }
  0x4f   :  { %594 = vmatpush3.bf16.msra.mxu1 %v628_v18 }
  0x50   :  { %572 = vmatpush3.bf16.msra.mxu0 %v617_v7  ;;  %595 = vmatprep.subr.bf16.mxu1 %v746_v13 }
  0x51   :  { %573 = vmatprep.subr.bf16.mxu0 %v618_v8 }
  0x53   :  { %596 = vmatpush3.bf16.msra.mxu1 %v629_v19 }
  0x54   :  { %574 = vmatpush3.bf16.msra.mxu0 %v618_v8  ;;  %597 = vmatprep.subr.bf16.mxu1 %v746_v13 }
  0x57   :  { %576 = vmatmul.mubr.bf16.vlgmr.msra.gmra.mrb[0].mxu0 %v620_v9  ;;  %598 = vmatpush3.bf16.msra.mxu1 %v630_v20 }
  0x58   :  { %579 = vmatprep.mubr.bf16.mxu0 %v621_v10 }
  0x5f   :  { %580 = vmatmul.mubr.bf16.gmra.mrb[4].mxu0 %v622_v11 }
 0x12a   :  { %v577_v22 = vpop.f32.mrb[0].mxu0 }
 0x12b   :  { %v834_v23 = vadd.f32 %v577_v22, %v516_v21  ;;  %v205_v24 = vpop.f32.mrb[1].mxu0 }
 0x12c   :  { %v836_v25 = vadd.f32 %v516_v21, %v205_v24  ;;  %v578_v26 = vpop.f32.mrb[2].mxu0 }
 0x12d   :  { %v238_v27 = vmul.f32 %v834_v23, %v834_v23  ;;  %v840_v28 = vadd.f32 %v578_v26, %v516_v21  ;;  %v208_v29 = vpop.f32.mrb[3].mxu0 }
 0x12e   :  { %v236_v30 = vmul.f32 %v836_v25, %v836_v25  ;;  %v844_v31 = vadd.f32 %v516_v21, %v208_v29 }
 0x12f   :  { %v246_v32 = vmul.f32 %v238_v27, %v834_v23  ;;  %v239_v33 = vmul.f32 %v840_v28, %v840_v28 }
 0x130   :  { %v244_v34 = vmul.f32 %v236_v30, %v836_v25  ;;  %v237_v35 = vmul.f32 %v844_v31, %v844_v31 }
 0x131   :  { %v254_v36 = vmul.f32 0.044715, %v246_v32  ;;  %v247_v37 = vmul.f32 %v239_v33, %v840_v28 }
 0x132   :  { %v252_v38 = vmul.f32 0.044715, %v244_v34  ;;  %v245_v39 = vmul.f32 %v237_v35, %v844_v31  ;;  %v581_v40 = vpop.f32.mrb[4].mxu0 }
 0x133   :  { %v262_v41 = vadd.f32 %v254_v36, %v834_v23  ;;  %v255_v42 = vmul.f32 0.044715, %v247_v37  ;;  %v855_v43 = vadd.f32 %v581_v40, %v516_v21  ;;  %v221_v44 = vpop.f32.mrb[5].mxu0 }
 0x134   :  { %v260_v45 = vadd.f32 %v252_v38, %v836_v25  ;;  %v253_v46 = vmul.f32 0.044715, %v245_v39  ;;  %v858_v47 = vadd.f32 %v516_v21, %v221_v44  ;;  %v582_v48 = vpop.f32.mrb[6].mxu0 }
 0x135   :  { %v270_v49 = vmul.f32 0.7978846, %v262_v41  ;;  %v263_v50 = vadd.f32 %v255_v42, %v840_v28  ;;  %v242_v51 = vmul.f32 %v855_v43, %v855_v43  ;;  %v863_v52 = vadd.f32 %v582_v48, %v516_v21  ;;  %v224_v53 = vpop.f32.mrb[7].mxu0 }
 0x136   :  { %v268_v54 = vmul.f32 0.7978846, %v260_v45  ;;  %v261_v55 = vadd.f32 %v253_v46, %v844_v31  ;;  %v240_v56 = vmul.f32 %v858_v47, %v858_v47  ;;  %v868_v57 = vadd.f32 %v516_v21, %v224_v53 }
 0x137   :  { %631 = vtanh.f32 %v270_v49  ;;  %v271_v58 = vmul.f32 0.7978846, %v263_v50  ;;  %v250_v59 = vmul.f32 %v242_v51, %v855_v43  ;;  %v243_v60 = vmul.f32 %v863_v52, %v863_v52 }
 0x138   :  { %633 = vtanh.f32 %v268_v54  ;;  %v269_v61 = vmul.f32 0.7978846, %v261_v55  ;;  %v248_v62 = vmul.f32 %v240_v56, %v858_v47  ;;  %v241_v63 = vmul.f32 %v868_v57, %v868_v57 }
 0x139   :  { %635 = vtanh.f32 %v271_v58  ;;  %v258_v0 = vmul.f32 0.044715, %v250_v59  ;;  %v251_v1 = vmul.f32 %v243_v60, %v863_v52 }
 0x13a   :  { %637 = vtanh.f32 %v269_v61  ;;  %v256_v2 = vmul.f32 0.044715, %v248_v62  ;;  %v249_v3 = vmul.f32 %v241_v63, %v868_v57 }
 0x13b   :  { %v266_v4 = vadd.f32 %v258_v0, %v855_v43  ;;  %v259_v5 = vmul.f32 0.044715, %v251_v1 }
 0x13c   :  { %v264_v6 = vadd.f32 %v256_v2, %v858_v47  ;;  %v257_v7 = vmul.f32 0.044715, %v249_v3 }
 0x13d   :  { %v274_v8 = vmul.f32 0.7978846, %v266_v4  ;;  %v267_v9 = vadd.f32 %v259_v5, %v863_v52 }
 0x13e   :  { %v272_v10 = vmul.f32 0.7978846, %v264_v6  ;;  %v265_v11 = vadd.f32 %v257_v7, %v868_v57 }
 0x13f   :  { %639 = vtanh.f32 %v274_v8  ;;  %v275_v12 = vmul.f32 0.7978846, %v267_v9 }
 0x140   :  { %641 = vtanh.f32 %v272_v10  ;;  %v273_v13 = vmul.f32 0.7978846, %v265_v11 }
 0x141   :  { %v632_v14 = vpop.eup %631  ;;  %643 = vtanh.f32 %v275_v12 }
 0x142   :  { %v634_v15 = vpop.eup %633  ;;  %v286_v16 = vadd.f32 1.0, %v632_v14  ;;  %645 = vtanh.f32 %v273_v13 }
 0x143   :  { %v636_v17 = vpop.eup %635  ;;  %v284_v18 = vadd.f32 1.0, %v634_v15 }
 0x144   :  { %v638_v19 = vpop.eup %637  ;;  %v294_v20 = vmul.f32 0.5, %v286_v16  ;;  %v287_v21 = vadd.f32 1.0, %v636_v17 }
 0x145   :  { %v292_v22 = vmul.f32 0.5, %v284_v18  ;;  %v285_v24 = vadd.f32 1.0, %v638_v19 }
 0x146   :  { %v302_v26 = vmul.f32 %v294_v20, %v834_v23  ;;  %v295_v27 = vmul.f32 0.5, %v287_v21 }
 0x147   :  { %v300_v29 = vmul.f32 %v292_v22, %v836_v25  ;;  %v293_v30 = vmul.f32 0.5, %v285_v24 }
 0x148   :  { %v321_v32 = vrot.slane %v302_v26, 4  ;;  %v303_v33 = vmul.f32 %v295_v27, %v840_v28 }
 0x149   :  { %v640_v34 = vpop.eup %639  ;;  %v309_v35 = vrot.slane %v300_v29, 4  ;;  %v301_v36 = vmul.f32 %v293_v30, %v844_v31 }
 0x14a   :  { %v642_v37 = vpop.eup %641  ;;  %v322_v38 = vadd.f32 %v321_v32, %v302_v26  ;;  %v327_v39 = vrot.slane %v303_v33, 4  ;;  %v290_v40 = vadd.f32 1.0, %v640_v34 }
 0x14b   :  { %v644_v41 = vpop.eup %643  ;;  %v310_v42 = vadd.f32 %v309_v35, %v300_v29  ;;  %v315_v44 = vrot.slane %v301_v36, 4  ;;  %v288_v45 = vadd.f32 1.0, %v642_v37 }
 0x14c   :  { %v646_v23 = vpop.eup %645  ;;  %v323_v46 = vrot.slane %v322_v38, 2  ;;  %v328_v48 = vadd.f32 %v327_v39, %v303_v33  ;;  %v298_v25 = vmul.f32 0.5, %v290_v40  ;;  %v291_v49 = vadd.f32 1.0, %v644_v41 }
 0x14d   :  { %v311_v50 = vrot.slane %v310_v42, 2  ;;  %v316_v51 = vadd.f32 %v315_v44, %v301_v36  ;;  %v296_v28 = vmul.f32 0.5, %v288_v45  ;;  %v289_v53 = vadd.f32 1.0, %v646_v23  ;;  %v529_v44 = vld [vmem:[%s909_s4] ss:$0 sm:$0xff] }
 0x14e   :  { %v324_v54 = vadd.f32 %v323_v46, %v322_v38  ;;  %v329_v55 = vrot.slane %v328_v48, 2  ;;  %v306_v31 = vmul.f32 %v298_v25, %v855_v43  ;;  %v299_v56 = vmul.f32 0.5, %v291_v49 }
 0x14f   :  { %v312_v58 = vadd.f32 %v311_v50, %v310_v42  ;;  %v317_v59 = vrot.slane %v316_v51, 2  ;;  %v304_v60 = vmul.f32 %v296_v28, %v858_v47  ;;  %v297_v61 = vmul.f32 0.5, %v289_v53 }
 0x150   :  { %v330_v62 = vadd.f32 %v329_v55, %v328_v48  ;;  %v345_v63 = vrot.slane %v306_v31, 4  ;;  %v307_v0 = vmul.f32 %v299_v56, %v863_v52  ;;  %v325_v5 = vrot.slane %v324_v54, 1 }
 0x151   :  { %v313_v1 = vrot.slane %v312_v58, 1  ;;  %v318_v2 = vadd.f32 %v317_v59, %v316_v51  ;;  %v333_v3 = vrot.slane %v304_v60, 4  ;;  %v305_v4 = vmul.f32 %v297_v61, %v868_v57 }
 0x152   :  { %v346_v6 = vadd.f32 %v345_v63, %v306_v31  ;;  %v351_v7 = vrot.slane %v307_v0, 4  ;;  %v331_v8 = vrot.slane %v330_v62, 1  ;;  %v326_v15 = vadd.f32 %v325_v5, %v324_v54 }
 0x153   :  { %v319_v43 = vrot.slane %v318_v2, 1  ;;  %v334_v9 = vadd.f32 %v333_v3, %v304_v60  ;;  %v339_v10 = vrot.slane %v305_v4, 4  ;;  %v314_v47 = vadd.f32 %v313_v1, %v312_v58 }
 0x154   :  { %v347_v11 = vrot.slane %v346_v6, 2  ;;  %v352_v12 = vadd.f32 %v351_v7, %v307_v0  ;;  %v332_v57 = vadd.f32 %v331_v8, %v330_v62 }
 0x155   :  { %v320_v13 = vadd.f32 %v319_v43, %v318_v2  ;;  %v335_v14 = vrot.slane %v334_v9, 2  ;;  %v340_v52 = vadd.f32 %v339_v10, %v305_v4 }
 0x156   :  { %v348_v16 = vadd.f32 %v347_v11, %v346_v6  ;;  %v353_v17 = vrot.slane %v352_v12, 2 }
 0x157   :  { %v336_v18 = vadd.f32 %v335_v14, %v334_v9  ;;  %v341_v19 = vrot.slane %v340_v52, 2  ;;  %v366_v20 = vsel %vm365_vm1, %v320_v13, %v314_v47 }
 0x158   :  { %v354_v21 = vadd.f32 %v353_v17, %v352_v12  ;;  %v368_v22 = vsel %vm367_vm2, %v326_v15, %v366_v20  ;;  %v349_v29 = vrot.slane %v348_v16, 1 }
 0x159   :  { %v337_v24 = vrot.slane %v336_v18, 1  ;;  %v342_v26 = vadd.f32 %v341_v19, %v340_v52  ;;  %v370_v27 = vsel %vm369_vm3, %v332_v57, %v368_v22 }
 0x15a   :  { %v355_v33 = vrot.slane %v354_v21, 1  ;;  %v350_v36 = vadd.f32 %v349_v29, %v348_v16 }
 0x15b   :  { %v338_v30 = vadd.f32 %v337_v24, %v336_v18  ;;  %v343_v32 = vrot.slane %v342_v26, 1 }
 0x15c   :  { %v356_v37 = vadd.f32 %v355_v33, %v354_v21 }
 0x15d   :  { %v344_v34 = vadd.f32 %v343_v32, %v342_v26  ;;  %v372_v35 = vsel %vm371_vm4, %v338_v30, %v370_v27 }
 0x15f   :  { %v374_v38 = vsel %vm373_vm5, %v344_v34, %v372_v35 }
 0x160   :  { %v376_v39 = vsel %vm375_vm6, %v350_v36, %v374_v38 }
 0x161   :  { %v378_v40 = vsel %vm377_vm7, %v356_v37, %v376_v39 }
 0x162   :  { %v386_v41 = vmul.f32 0.125, %v378_v40 }
 0x164   :  { %v387_v42 = vpack.c.bf16 %v386_v41, %v386_v41 }
 0x166   :  { %600 = vmatmul.mubr.bf16.vlgmr.msra.gmra.mrb[0].mxu1 %v387_v42 }
 0x239   :  { %v493_v45 = vpop.f32.mrb[0].mxu1 }
 0x23a   :  { %v494_v23 = vadd.f32 %v529_v44, %v493_v45  ;;  %v601_v46 = vpop.f32.mrb[1].mxu1 }
 0x23b   :  { %v496_v48 = vpop.f32.mrb[2].mxu1 }
 0x23c   :  { %499 = vst [vmem:[#allocation9] sm:$0xff] %v494_v23  ;;  %v602_v25 = vpop.f32.mrb[3].mxu1 }
 0x23d   :  { %724 = shalt.err (!%p721_p0)
}
 0x23e   :  { %s725_s4 = scalar_lea.hbm %s910_s5, 128 }
 0x23f   :  { %p726_p1 = scmp.ne.s32.totalorder %s910_s5, %s725_s4  ;;  %p729_p2 = scmp.lt.u32.totalorder %s725_s4, %s910_s5 }
 0x241   :  { %p731_p3 = pnand %p729_p2, %p726_p1 }
 0x243   :  { %734 = shalt.err (!%p731_p3)
}
 0x244   :  { %509 = dma.vmem_to_hbm [thread:$0]  %s507_s7, 128, %s910_s5, [#allocation5]  }
 0x245   :  { %739 = dma.done.wait [#allocation5], 128  }
 0x246   :  { %740 = vsyncadd [#allocation5], 4294967168 }
 0x247   :  { %513 = vsyncpa [#allocation4], 1 }
 0x248   :  { %514 = vsyncpa [#allocation7], 1 }
 0x249   :  { %515 = vsyncpa [#allocation5], 1 }

</bundles_post_ra>
